<compile_context>
chip_gen: v7x
topology: tpu7x:2x2x1
jax: 0.10.0
libtpu: 0.0.40
codegen_flags: <defaults>
</compile_context>

<pallas_src>
import functools

import jax
import jax.numpy as jnp
from jax.experimental import pallas as pl
from jax.experimental.pallas import tpu as pltpu


def _round_up(a, b):
    return (a + b - 1) // b * b


def _vq_nct_kernel(x_ref, cb_ref, cbt_ref, cb2_ref,
                   xd_ref, counts_ref, sqerr_ref, *, t_total):
    """One (code_dim, TILE_T) slab of one batch element."""
    tj = pl.program_id(1)

    _, d, tt = x_ref.shape          # block is (1, D, TILE_T)
    k = cb_ref.shape[0]

    x = x_ref[...].reshape(d, tt).astype(jnp.float32)      # (D, TT)
    cb = cb_ref[...].astype(jnp.float32)                    # (K, D)
    cbt = cbt_ref[...].astype(jnp.float32)                   # (D, K)
    cb2 = cb2_ref[...].astype(jnp.float32)                   # (K, 1)

    # scores[k, t] = <codebook[k], x[:, t]>  -- single MXU matmul, no transposes.
    s = jnp.dot(cb, x, preferred_element_type=jnp.float32)   # (K, TT)

    # Distance used only for the argmin over codes; the per-token ||x||^2 term
    # is constant along the code axis and is dropped (argmin-invariant).
    dist = cb2 - 2.0 * s                                      # (K, TT)

    # First-occurrence nearest code per column (matches torch.min tie-break):
    # value-min over codes, then min row-index among the exact minima.
    row_f = jax.lax.broadcasted_iota(jnp.int32, (k, tt), 0).astype(jnp.float32)
    min_d = jnp.min(dist, axis=0, keepdims=True)              # (1, TT)
    cand = jnp.where(dist == min_d, row_f, jnp.float32(k))
    min_row = jnp.min(cand, axis=0, keepdims=True)             # (1, TT)

    # Mask out padded time steps (beyond the true T of this input).
    col = jax.lax.broadcasted_iota(jnp.int32, (1, tt), 1) + tj * tt
    valid = col < t_total                                      # (1, TT)

    onehot = jnp.logical_and(row_f == min_row, valid).astype(jnp.float32)  # (K, TT)

    # Dequantize: xd[:, t] = codebook[code_idx[t]]  -- one-hot gather on the MXU.
    xd = jnp.dot(cbt, onehot, preferred_element_type=jnp.float32)  # (D, TT)
    xd_ref[...] = xd.reshape(xd_ref.shape).astype(xd_ref.dtype)

    # Per-tile partial outputs (padded columns contribute exactly zero since
    # both x (zero-padded) and xd (masked one-hot) are zero there).
    counts_ref[...] = jnp.sum(onehot, axis=-1, keepdims=True).reshape(counts_ref.shape)
    diff = x - xd
    sqerr_ref[...] = jnp.sum(diff * diff, axis=-1, keepdims=True).reshape(sqerr_ref.shape)


@functools.partial(jax.jit, static_argnames=("tile_t",))
def quantize_reset_forward(x, codebook, *, tile_t=512):
    """Eval-mode forward of QuantizeReset.

    Args:
      x:        (N, code_dim, T) float32
      codebook: (nb_code, code_dim) float32
      tile_t:   time-tile size (multiple of 128 is enforced when T > tile_t)
    Returns:
      (x_d, commit_loss, perplexity) with x_d of shape (N, code_dim, T).
    """
    n, d, t = x.shape
    k, d2 = codebook.shape
    assert d == d2, "code_dim mismatch between x and codebook"

    if t <= tile_t:
        tile = t                      # single tile along T (block == full dim)
        t_pad = t
    else:
        tile = max(128, (tile_t // 128) * 128)   # lane-aligned multi-tile
        t_pad = _round_up(t, tile)
    g_t = t_pad // tile

    x_f = x.astype(jnp.float32)
    x_p = x_f if t_pad == t else jnp.pad(x_f, ((0, 0), (0, 0), (0, t_pad - t)))

    cb = codebook.astype(jnp.float32)                         # (K, D)
    cbt = cb.T                                                # (D, K), tiny, hoisted
    cb2 = jnp.sum(cb * cb, axis=-1, keepdims=True)            # (K, 1), hoisted

    kernel = functools.partial(_vq_nct_kernel, t_total=t)

    xd_p, counts_p, sqerr_p = pl.pallas_call(
        kernel,
        out_shape=(
            jax.ShapeDtypeStruct((n, d, t_pad), jnp.float32),    # x_d (NCT)
            jax.ShapeDtypeStruct((n, g_t, k, 1), jnp.float32),   # per-tile counts
            jax.ShapeDtypeStruct((n, g_t, d, 1), jnp.float32),   # per-tile sq-err
        ),
        grid_spec=pltpu.PrefetchScalarGridSpec(
            num_scalar_prefetch=0,
            grid=(n, g_t),
            in_specs=[
                pl.BlockSpec((1, d, tile), lambda i, j: (i, 0, j)),  # x slab
                pl.BlockSpec((k, d), lambda i, j: (0, 0)),           # codebook
                pl.BlockSpec((d, k), lambda i, j: (0, 0)),           # codebook^T
                pl.BlockSpec((k, 1), lambda i, j: (0, 0)),           # ||codebook||^2
            ],
            out_specs=[
                pl.BlockSpec((1, d, tile), lambda i, j: (i, 0, j)),
                pl.BlockSpec((1, 1, k, 1), lambda i, j: (i, j, 0, 0)),
                pl.BlockSpec((1, 1, d, 1), lambda i, j: (i, j, 0, 0)),
            ],
        ),
        compiler_params=pltpu.CompilerParams(
            dimension_semantics=("parallel", "parallel"),
        ),
    )(x_p, cb, cbt, cb2)

    x_d = xd_p if t_pad == t else xd_p[:, :, :t]

    # compute_perplexity (eval mode): code-usage histogram over all N*T tokens.
    counts = jnp.sum(counts_p, axis=(0, 1))[:, 0]            # (K,)
    total = jnp.sum(counts)
    prob = counts / total
    perplexity = jnp.exp(-jnp.sum(prob * jnp.log(prob + 1e-7)))

    # commit_loss = mse(x, x_d.detach()) over all N*T*D elements.
    commit_loss = jnp.sum(sqerr_p) / jnp.float32(n * t * d)

    # Straight-through estimator: forward value of x + (x_d - x).detach() is x_d.
    return x_d, commit_loss, perplexity


def _reference_forward(x, codebook):
    """Pure-JAX eval-mode reference mirroring the PyTorch module."""
    n, d, t = x.shape
    xf = jnp.transpose(x, (0, 2, 1)).reshape(n * t, d)
    dist = (jnp.sum(xf * xf, axis=-1, keepdims=True)
            - 2.0 * xf @ codebook.T
            + jnp.sum(codebook * codebook, axis=-1)[None, :])
    idx = jnp.argmin(dist, axis=-1)
    xd = codebook[idx]
    counts = jnp.sum(jax.nn.one_hot(idx, codebook.shape[0], dtype=jnp.float32), axis=0)
    prob = counts / jnp.sum(counts)
    perplexity = jnp.exp(-jnp.sum(prob * jnp.log(prob + 1e-7)))
    commit_loss = jnp.mean((xf - xd) ** 2)
    x_d = jnp.transpose(xd.reshape(n, t, d), (0, 2, 1))
    return x_d, commit_loss, perplexity


if __name__ == "__main__":
    nb_code = 64
    code_dim = 32

    key = jax.random.PRNGKey(0)
    k_cb, k_x1, k_x2 = jax.random.split(key, 3)
    codebook = jax.random.normal(k_cb, (nb_code, code_dim), dtype=jnp.float32)

    # Small single-tile case (N, code_dim, T) as in the module's forward.
    N, T = 2, 8
    x = jax.random.normal(k_x1, (N, code_dim, T), dtype=jnp.float32)
    x_d, commit_loss, perplexity = quantize_reset_forward(x, codebook)
    jax.block_until_ready((x_d, commit_loss, perplexity))
    assert x_d.shape == (N, code_dim, T)
    assert commit_loss.shape == ()
    assert perplexity.shape == ()
    rd, rl, rp = _reference_forward(x, codebook)
    assert jnp.allclose(x_d, rd, atol=1e-4), "x_d mismatch"
    assert jnp.allclose(commit_loss, rl, rtol=1e-4, atol=1e-6), "commit_loss mismatch"
    assert jnp.allclose(perplexity, rp, rtol=1e-4), "perplexity mismatch"

    # Multi-tile + ragged-T case (exercises tiling, zero-padding and masking).
    N2, T2 = 2, 200
    x2 = jax.random.normal(k_x2, (N2, code_dim, T2), dtype=jnp.float32)
    x_d2, cl2, pp2 = quantize_reset_forward(x2, codebook, tile_t=128)
    jax.block_until_ready((x_d2, cl2, pp2))
    assert x_d2.shape == (N2, code_dim, T2)
    rd2, rl2, rp2 = _reference_forward(x2, codebook)
    assert jnp.allclose(x_d2, rd2, atol=1e-4), "x_d mismatch (tiled)"
    assert jnp.allclose(cl2, rl2, rtol=1e-4, atol=1e-6), "commit_loss mismatch (tiled)"
    assert jnp.allclose(pp2, rp2, rtol=1e-4), "perplexity mismatch (tiled)"

    print("KERNEL_OK")
</pallas_src>

<mosaic_0001>
module attributes {stable_mosaic.version = 11 : i64} {
  func.func @_vq_nct_kernel(%arg0: i32, %arg1: i32, %arg2: memref<1x32x8xf32, #tpu.memory_space<vmem>>, %arg3: memref<64x32xf32, #tpu.memory_space<vmem>>, %arg4: memref<32x64xf32, #tpu.memory_space<vmem>>, %arg5: memref<64x1xf32, #tpu.memory_space<vmem>>, %arg6: memref<1x32x8xf32, #tpu.memory_space<vmem>>, %arg7: memref<1x1x64x1xf32, #tpu.memory_space<vmem>>, %arg8: memref<1x1x32x1xf32, #tpu.memory_space<vmem>>) attributes {dimension_semantics = [#tpu.dimension_semantics<parallel>, #tpu.dimension_semantics<parallel>], iteration_bounds = array<i64: 2, 1>, scalar_prefetch = 0 : i64, scratch_operands = 0 : i64, tpu.core_type = #tpu.core_type<tc>, window_params = [{transform_indices = @transform_0, window_bounds = array<i64: 1, 32, 8>}, {pipeline_mode = #tpu.pipeline_mode<synchronous>, transform_indices = @transform_1, window_bounds = array<i64: 64, 32>}, {pipeline_mode = #tpu.pipeline_mode<synchronous>, transform_indices = @transform_2, window_bounds = array<i64: 32, 64>}, {pipeline_mode = #tpu.pipeline_mode<synchronous>, transform_indices = @transform_3, window_bounds = array<i64: 64, 1>}, {transform_indices = @transform_4, window_bounds = array<i64: 1, 32, 8>}, {transform_indices = @transform_5, window_bounds = array<i64: 1, 1, 64, 1>}, {transform_indices = @transform_6, window_bounds = array<i64: 1, 1, 32, 1>}]} {
    %c0 = arith.constant 0 : index
    %c0_0 = arith.constant 0 : index
    %c0_1 = arith.constant 0 : index
    %0 = vector.load %arg2[%c0, %c0_0, %c0_1] : memref<1x32x8xf32, #tpu.memory_space<vmem>>, vector<1x32x8xf32>
    %1 = vector.shape_cast %0 : vector<1x32x8xf32> to vector<32x8xf32>
    %c0_2 = arith.constant 0 : index
    %c0_3 = arith.constant 0 : index
    %2 = vector.load %arg3[%c0_2, %c0_3] : memref<64x32xf32, #tpu.memory_space<vmem>>, vector<64x32xf32>
    %c0_4 = arith.constant 0 : index
    %c0_5 = arith.constant 0 : index
    %3 = vector.load %arg4[%c0_4, %c0_5] : memref<32x64xf32, #tpu.memory_space<vmem>>, vector<32x64xf32>
    %c0_6 = arith.constant 0 : index
    %c0_7 = arith.constant 0 : index
    %4 = vector.load %arg5[%c0_6, %c0_7] : memref<64x1xf32, #tpu.memory_space<vmem>>, vector<64x1xf32>
    %cst = arith.constant dense<0.000000e+00> : vector<64x8xf32>
    %5 = tpu.matmul %2, %1, %cst {dimension_numbers = #tpu.dot_dimension_numbers<[1], [0], [0], [1], [0, 0, 1, 1], [], []>} : vector<64x32xf32>, vector<32x8xf32>, vector<64x8xf32> -> vector<64x8xf32>
    %cst_8 = arith.constant 2.000000e+00 : f32
    %6 = vector.broadcast %cst_8 : f32 to vector<64x8xf32>
    %7 = arith.mulf %6, %5 : vector<64x8xf32>
    %8 = vector.broadcast %4 : vector<64x1xf32> to vector<64x8xf32>
    %9 = arith.subf %8, %7 : vector<64x8xf32>
    %10 = tpu.iota {dimensions = array<i32: 0>} : vector<64x8xi32>
    %11 = arith.sitofp %10 : vector<64x8xi32> to vector<64x8xf32>
    %cst_9 = arith.constant dense<0x7F800000> : vector<8xf32>
    %12 = vector.multi_reduction <minimumf>, %9, %cst_9 [0] : vector<64x8xf32> to vector<8xf32>
    %13 = vector.shape_cast %12 : vector<8xf32> to vector<1x8xf32>
    %14 = vector.broadcast %13 : vector<1x8xf32> to vector<64x8xf32>
    %15 = arith.cmpf oeq, %9, %14 : vector<64x8xf32>
    %cst_10 = arith.constant 6.400000e+01 : f32
    %16 = vector.broadcast %cst_10 : f32 to vector<64x8xf32>
    %17 = arith.select %15, %11, %16 : vector<64x8xi1>, vector<64x8xf32>
    %cst_11 = arith.constant dense<0x7F800000> : vector<8xf32>
    %18 = vector.multi_reduction <minimumf>, %17, %cst_11 [0] : vector<64x8xf32> to vector<8xf32>
    %19 = vector.shape_cast %18 : vector<8xf32> to vector<1x8xf32>
    %20 = tpu.iota {dimensions = array<i32: 1>} : vector<1x8xi32>
    %c8_i32 = arith.constant 8 : i32
    %21 = arith.muli %arg1, %c8_i32 : i32
    %22 = vector.broadcast %21 : i32 to vector<1x8xi32>
    %23 = arith.addi %20, %22 : vector<1x8xi32>
    %c8_i32_12 = arith.constant 8 : i32
    %24 = vector.broadcast %c8_i32_12 : i32 to vector<1x8xi32>
    %25 = arith.cmpi slt, %23, %24 : vector<1x8xi32>
    %26 = vector.broadcast %19 : vector<1x8xf32> to vector<64x8xf32>
    %27 = arith.cmpf oeq, %11, %26 : vector<64x8xf32>
    %28 = vector.broadcast %25 : vector<1x8xi1> to vector<64x8xi1>
    %29 = arith.andi %27, %28 : vector<64x8xi1>
    %30 = arith.extui %29 : vector<64x8xi1> to vector<64x8xi32>
    %31 = arith.sitofp %30 : vector<64x8xi32> to vector<64x8xf32>
    %cst_13 = arith.constant dense<0.000000e+00> : vector<32x8xf32>
    %32 = tpu.matmul %3, %31, %cst_13 {dimension_numbers = #tpu.dot_dimension_numbers<[1], [0], [0], [1], [0, 0, 1, 1], [], []>} : vector<32x64xf32>, vector<64x8xf32>, vector<32x8xf32> -> vector<32x8xf32>
    %33 = vector.shape_cast %32 : vector<32x8xf32> to vector<1x32x8xf32>
    %c0_14 = arith.constant 0 : index
    %c0_15 = arith.constant 0 : index
    %c0_16 = arith.constant 0 : index
    %34 = vector.load %arg6[%c0_14, %c0_15, %c0_16] : memref<1x32x8xf32, #tpu.memory_space<vmem>>, vector<1x32x8xf32>
    tpu.vector_store %arg6[%c0_14, %c0_15, %c0_16], %33 {strides = array<i32>} : memref<1x32x8xf32, #tpu.memory_space<vmem>>, vector<1x32x8xf32>,
    %cst_17 = arith.constant dense<0.000000e+00> : vector<64xf32>
    %35 = vector.multi_reduction <add>, %31, %cst_17 [1] : vector<64x8xf32> to vector<64xf32>
    %36 = vector.shape_cast %35 : vector<64xf32> to vector<64x1xf32>
    %37 = vector.shape_cast %36 : vector<64x1xf32> to vector<1x1x64x1xf32>
    %c0_18 = arith.constant 0 : index
    %c0_19 = arith.constant 0 : index
    %c0_20 = arith.constant 0 : index
    %c0_21 = arith.constant 0 : index
    %38 = vector.load %arg7[%c0_18, %c0_19, %c0_20, %c0_21] : memref<1x1x64x1xf32, #tpu.memory_space<vmem>>, vector<1x1x64x1xf32>
    tpu.vector_store %arg7[%c0_18, %c0_19, %c0_20, %c0_21], %37 {strides = array<i32>} : memref<1x1x64x1xf32, #tpu.memory_space<vmem>>, vector<1x1x64x1xf32>,
    %39 = arith.subf %1, %32 : vector<32x8xf32>
    %40 = arith.mulf %39, %39 : vector<32x8xf32>
    %cst_22 = arith.constant dense<0.000000e+00> : vector<32xf32>
    %41 = vector.multi_reduction <add>, %40, %cst_22 [1] : vector<32x8xf32> to vector<32xf32>
    %42 = vector.shape_cast %41 : vector<32xf32> to vector<32x1xf32>
    %43 = vector.shape_cast %42 : vector<32x1xf32> to vector<1x1x32x1xf32>
    %c0_23 = arith.constant 0 : index
    %c0_24 = arith.constant 0 : index
    %c0_25 = arith.constant 0 : index
    %c0_26 = arith.constant 0 : index
    %44 = vector.load %arg8[%c0_23, %c0_24, %c0_25, %c0_26] : memref<1x1x32x1xf32, #tpu.memory_space<vmem>>, vector<1x1x32x1xf32>
    tpu.vector_store %arg8[%c0_23, %c0_24, %c0_25, %c0_26], %43 {strides = array<i32>} : memref<1x1x32x1xf32, #tpu.memory_space<vmem>>, vector<1x1x32x1xf32>,
    return
  }
  func.func @transform_0(%arg0: i32, %arg1: i32) -> (i32, i32, i32) {
    %c0_i32 = arith.constant 0 : i32
    %c0_i32_0 = arith.constant 0 : i32
    return %arg0, %c0_i32, %arg1 : i32, i32, i32
  }
  func.func @transform_1(%arg0: i32, %arg1: i32) -> (i32, i32) {
    %c0_i32 = arith.constant 0 : i32
    %c0_i32_0 = arith.constant 0 : i32
    %c0_i32_1 = arith.constant 0 : i32
    return %c0_i32, %c0_i32_0 : i32, i32
  }
  func.func @transform_2(%arg0: i32, %arg1: i32) -> (i32, i32) {
    %c0_i32 = arith.constant 0 : i32
    %c0_i32_0 = arith.constant 0 : i32
    %c0_i32_1 = arith.constant 0 : i32
    return %c0_i32, %c0_i32_0 : i32, i32
  }
  func.func @transform_3(%arg0: i32, %arg1: i32) -> (i32, i32) {
    %c0_i32 = arith.constant 0 : i32
    %c0_i32_0 = arith.constant 0 : i32
    %c0_i32_1 = arith.constant 0 : i32
    return %c0_i32, %c0_i32_0 : i32, i32
  }
  func.func @transform_4(%arg0: i32, %arg1: i32) -> (i32, i32, i32) {
    %c0_i32 = arith.constant 0 : i32
    %c0_i32_0 = arith.constant 0 : i32
    return %arg0, %c0_i32, %arg1 : i32, i32, i32
  }
  func.func @transform_5(%arg0: i32, %arg1: i32) -> (i32, i32, i32, i32) {
    %c0_i32 = arith.constant 0 : i32
    %c0_i32_0 = arith.constant 0 : i32
    %c0_i32_1 = arith.constant 0 : i32
    return %arg0, %arg1, %c0_i32, %c0_i32_0 : i32, i32, i32, i32
  }
  func.func @transform_6(%arg0: i32, %arg1: i32) -> (i32, i32, i32, i32) {
    %c0_i32 = arith.constant 0 : i32
    %c0_i32_0 = arith.constant 0 : i32
    %c0_i32_1 = arith.constant 0 : i32
    return %arg0, %arg1, %c0_i32, %c0_i32_0 : i32, i32, i32, i32
  }
}

</mosaic_0001>

<bundles_post_ra>
// kernel: quantize_reset_forward.1
= control target key start
LH: loop header
LB: loop body
LE: loop exit
PB: predicated region body
PF: predicated region fallthrough
CT: control target
= control target key end

     0   :  { %s1230_s21 = smov 0   ;;  %s1232_s22 = smov 0   ;;  %s1489_s0 = inlined_call_operand.vmem [shape: f32[2,32,8], index: 0, kind: input, shape index: {}]   ;;  %s1490_s1 = inlined_call_operand.vmem [shape: f32[64,32], index: 1, kind: input, shape index: {}]   ;;  %s1491_s2 = inlined_call_operand.vmem [shape: f32[32,64], index: 2, kind: input, shape index: {}]   ;;  %s1492_s3 = inlined_call_operand.vmem [shape: f32[64,1], index: 3, kind: input, shape index: {}]   ;;  %s1493_s4 = inlined_call_operand.vmem [shape: f32[2,32,8], index: 4, kind: output, shape index: {0}]   ;;  %s1494_s5 = inlined_call_operand.vmem [shape: f32[2,1,64,1], index: 5, kind: output, shape index: {1}]   ;;  %s1495_s6 = inlined_call_operand.vmem [shape: f32[2,1,32,1], index: 6, kind: output, shape index: {2}]  }
   0x1   :  { %s1234_s23 = smov 0  }
   0x2 LB: > { %s29_s24 = sadd.s32 1, %s1186_s22  ;;  %p1006_p0 = scmp.ge.s32.totalorder %s1190_s23, 1  ;;  %s1190_s23 = sphi %s1234_s23, %s17_s23   ;;  %s1186_s22 = sphi %s1232_s22, %s1505_s22   ;;  %s1182_s21 = sphi %s1230_s21, %s1504_s21  }
   0x3   : > { %p31_p1 = scmp.ge.s32.totalorder %s29_s24, 2  ;;  %p240_p2 = scmp.lt.s32.totalorder %s1190_s23, 3 }
   0x5   : > { %s1507_s24 = smov (%p31_p1, %s29_s24), 0  ;;  %p241_p3 = pnand %p1006_p0, %p240_p2 }
   0x6   : > { %p294_p4 = scmp.lt.s32.totalorder (!%p241_p3), %s1182_s21, 1  ;;  %v332_v0 = vld [vmem:[%s1490_s1] sm:$0xff] (!%p241_p3)  ;;  %vm352_vm0 = vcmask (!%p241_p3), 261120   ;;  %v1192_v1 = vmov (!%p241_p3), 0   ;;  %v346_v2 = vld [vmem:[%s1492_s3 + $0x10] sm:$0xff] (!%p241_p3)  ;;  %v347_v4 = vld [vmem:[%s1492_s3 + $0x18] sm:$0xff] (!%p241_p3) }
   0x7   : > { %244 = sbr.rel (%p241_p3) target bundleno = 686 (0x2ae), region = 36  ;;  %1081 = vmatprep.mubr.msk.f32.mxu0 (!%p241_p3), %vm352_vm0, %v332_v0  ;;  %1167 = vset.pattern.permute.xlu1 (!%p241_p3), %v1192_v1  ;;  %v344_v3 = vld [vmem:[%s1492_s3] sm:$0xff] (!%p241_p3)  ;;  %v345_v5 = vld [vmem:[%s1492_s3 + $0x8] sm:$0xff] (!%p241_p3)  ;;  %v351_v14 = vld [vmem:[%s1492_s3 + $0x38] sm:$0xff] (!%p241_p3)  ;;  %vm654_vm1 = vcmask (!%p241_p3), 523264   ;;  %vm555_vm2 = vcmask (!%p241_p3), 64512  }
   0x8   : > { %1166 = vset.pattern.permute.xlu0 (!%p241_p3), %v1192_v1  ;;  %502 = vperm.xlu1 (!%p241_p3), %1167, %v346_v2   ;;  %v349_v12 = vld [vmem:[%s1492_s3 + $0x28] sm:$0xff] (!%p241_p3)  ;;  %v348_v13 = vld [vmem:[%s1492_s3 + $0x20] sm:$0xff] (!%p241_p3)  ;;  %v350_v15 = vld [vmem:[%s1492_s3 + $0x30] sm:$0xff] (!%p241_p3) }
   0x9   : > { %492 = vperm.xlu0 (!%p241_p3), %1166, %v344_v3   ;;  %v333_v16 = vld [vmem:[%s1490_s1 + $0x8] sm:$0xff] (!%p241_p3)  ;;  %v334_v17 = vld [vmem:[%s1490_s1 + $0x10] sm:$0xff] (!%p241_p3)  ;;  %v335_v18 = vld [vmem:[%s1490_s1 + $0x18] sm:$0xff] (!%p241_p3) }
   0xa   : > { %v336_v19 = vld [vmem:[%s1490_s1 + $0x20] sm:$0xff] (!%p241_p3)  ;;  %v337_v20 = vld [vmem:[%s1490_s1 + $0x28] sm:$0xff] (!%p241_p3)  ;;  %v338_v21 = vld [vmem:[%s1490_s1 + $0x30] sm:$0xff] (!%p241_p3) }
   0xb   : > { %v339_v22 = vld [vmem:[%s1490_s1 + $0x38] sm:$0xff] (!%p241_p3)  ;;  %v340_v23 = vld [vmem:[%s1491_s2] sm:$0xff] (!%p241_p3) }
   0xc   : > { %507 = vperm.xlu1 (!%p241_p3), %1167, %v347_v4   ;;  %1109 = vmatprep.mubr.msk.f32.mxu1 (!%p241_p3), %vm654_vm1, %v340_v23 }
   0xd   : > { %497 = vperm.xlu0 (!%p241_p3), %1166, %v345_v5  }
   0xe   : > { %s1509_s21 = smov (!%p294_p4, %s1182_s21), 1 }
   0xf   : > { %s1261_s7 = sshll.u32 %s1509_s21, 5  ;;  %s1047_s30 = sshll.u32 %s1509_s21, 6 }
  0x10   : > { %s301_s12 = scalar_lea.vmem %s1489_s0, %s1261_s7  ;;  %517 = vperm.xlu1 %1167, %v349_v12   ;;  %s318_s10 = scalar_lea.vmem %s1494_s5, %s1047_s30 }
  0x11   : > { %v1273_v6 = vld [vmem:[%s301_s12] sm:$0xff]  ;;  %v1275_v7 = vld [vmem:[%s301_s12 + $0x8] sm:$0xff]  ;;  %v1277_v8 = vld [vmem:[%s301_s12 + $0x10] sm:$0xff]  ;;  %512 = vperm.xlu0 %1166, %v348_v13   ;;  %s327_s15 = scalar_lea.vmem %s1495_s6, %s1261_s7 }
  0x12   : > { %v1115_v9 = vpack.c.bf16 %v1275_v7, %v1273_v6  ;;  %v1281_v10 = vld [vmem:[%s301_s12 + $0x18] sm:$0xff]  ;;  %s309_s12 = scalar_lea.vmem %s1493_s4, %s1261_s7 }
  0x13   : > { %v1119_v11 = vpack.c.bf16 %v1281_v10, %v1277_v8 }
  0x14   : > { %1116 = vmatprep.subr.bf16.mxu0 %v1115_v9  ;;  %527 = vperm.xlu1 %1167, %v351_v14  }
  0x15   : > { %1118 = vmatpush3.bf16.msra.mxu0 %v1115_v9  ;;  %522 = vperm.xlu0 %1166, %v350_v15   ;;  %v538_v9 = vlaneseq }
  0x16   : > { %1120 = vmatprep.subr.bf16.mxu0 %v1119_v11 }
  0x17   : > { %v539_v13 = vshrl.u32 %v538_v9, 7 }
  0x19   : > { %1122 = vmatpush3.bf16.msra.mxu0 %v1119_v11  ;;  %v1357_v23 = vadd.s32 40, %v539_v13 }
  0x1c   : > { %1082 = vmatmul.mubr.msk.f32.vlgmr.msra.gmra.mrb[0].mxu0 %vm352_vm0, %v333_v16  ;;  %v541_v16 = vadd.s32 16, %v539_v13 }
  0x1d   : > { %1084 = vmatprep.mubr.msk.f32.mxu0 %vm352_vm0, %v334_v17  ;;  %v1349_v17 = vadd.s32 24, %v539_v13 }
  0x20   : > { %1085 = vmatmul.mubr.msk.f32.gmra.mrb[2].mxu0 %vm352_vm0, %v335_v18  ;;  %v1351_v18 = vadd.s32 48, %v539_v13 }
  0x21   : > { %1087 = vmatprep.mubr.msk.f32.mxu0 %vm352_vm0, %v336_v19  ;;  %v1353_v19 = vadd.s32 56, %v539_v13 }
  0x24   : > { %1088 = vmatmul.mubr.msk.f32.gmra.mrb[4].mxu0 %vm352_vm0, %v337_v20 }
  0x25   : > { %1090 = vmatprep.mubr.msk.f32.mxu0 %vm352_vm0, %v338_v21  ;;  %v540_v21 = vadd.s32 8, %v539_v13 }
  0x28   : > { %1091 = vmatmul.mubr.msk.f32.gmra.mrb[6].mxu0 %vm352_vm0, %v339_v22  ;;  %v1355_v22 = vadd.s32 32, %v539_v13 }
  0x87   : > { %v503_v24 = vpop.permute.xlu1 %502 }
  0x88   : > { %v493_v25 = vpop.permute.xlu0 %492 }
  0x8b   : > { %v508_v28 = vpop.permute.xlu1 %507 }
  0x8c   : > { %v498_v29 = vpop.permute.xlu0 %497 }
  0x8f   : > { %v518_v34 = vpop.permute.xlu1 %517 }
  0x90   : > { %v513_v37 = vpop.permute.xlu0 %512 }
  0x93   : > { %v528_v53 = vpop.permute.xlu1 %527 }
  0x94   : > { %v523_v58 = vpop.permute.xlu0 %522 }
  0xef   : > { %v1083_v26 = vpop.f32.mrb[0].mxu0 }
  0xf0   : > { %v443_v27 = vpop.f32.mrb[1].mxu0  ;;  %v483_v30 = vmul.f32 2.0, %v1083_v26  ;;  %v550_v26 = vcvt.s32.f32 %v1349_v17 }
  0xf1   : > { %v482_v32 = vmul.f32 2.0, %v443_v27  ;;  %v553_v27 = vcvt.s32.f32 %v1351_v18 }
  0xf2   : > { %v1329_v35 = vsub.f32 %v498_v29, %v483_v30  ;;  %v547_v30 = vcvt.s32.f32 %v539_v13 }
  0xf3   : > { %v1086_v31 = vpop.f32.mrb[2].mxu0  ;;  %v1331_v38 = vsub.f32 %v493_v25, %v482_v32  ;;  %v549_v25 = vcvt.s32.f32 %v541_v16  ;;  %v551_v32 = vcvt.s32.f32 %v1355_v22 }
  0xf4   : > { %v453_v33 = vpop.f32.mrb[3].mxu0  ;;  %v485_v39 = vmul.f32 2.0, %v1086_v31  ;;  %v557_v45 = vsel %vm555_vm2, %v1329_v35, inf  ;;  %v548_v31 = vcvt.s32.f32 %v540_v21 }
  0xf5   : > { %v484_v42 = vmul.f32 2.0, %v453_v33  ;;  %v556_v48 = vsel %vm555_vm2, %v1331_v38, inf  ;;  %v552_v33 = vcvt.s32.f32 %v1357_v23 }
  0xf6   : > { %v533_v49 = vsub.f32 %v508_v28, %v485_v39  ;;  %v554_v28 = vcvt.s32.f32 %v1353_v19 }
  0xf7   : > { %v1089_v36 = vpop.f32.mrb[4].mxu0  ;;  %v532_v54 = vsub.f32 %v503_v24, %v484_v42 }
  0xf8   : > { %v487_v40 = vmul.f32 2.0, %v1089_v36  ;;  %v463_v41 = vpop.f32.mrb[5].mxu0  ;;  %v559_v62 = vsel %vm555_vm2, %v533_v49, inf }
  0xf9   : > { %v486_v43 = vmul.f32 2.0, %v463_v41  ;;  %v558_v1 = vsel %vm555_vm2, %v532_v54, inf }
  0xfa   : > { %v1333_v44 = vsub.f32 %v518_v34, %v487_v40 }
  0xfb   : > { %v1337_v46 = vsub.f32 %v513_v37, %v486_v43  ;;  %v1092_v47 = vpop.f32.mrb[6].mxu0 }
  0xfc   : > { %v562_v50 = vsel %vm555_vm2, %v1333_v44, inf  ;;  %v489_v51 = vmul.f32 2.0, %v1092_v47  ;;  %v473_v52 = vpop.f32.mrb[7].mxu0 }
  0xfd   : > { %v563_v55 = vmin.f32 %v557_v45, %v562_v50  ;;  %v560_v56 = vsel %vm555_vm2, %v1337_v46, inf  ;;  %v488_v57 = vmul.f32 2.0, %v473_v52 }
  0xfe   : > { %v561_v59 = vmin.f32 %v556_v48, %v560_v56  ;;  %v537_v60 = vsub.f32 %v528_v53, %v489_v51 }
  0xff   : > { %v536_v61 = vsub.f32 %v523_v58, %v488_v57 }
 0x100   : > { %v568_v63 = vmin.f32 %v561_v59, %v563_v55  ;;  %v566_v0 = vsel %vm555_vm2, %v537_v60, inf }
 0x101   : > { %v567_v2 = vmin.f32 %v559_v62, %v566_v0  ;;  %v564_v3 = vsel %vm555_vm2, %v536_v61, inf }
 0x102   : > { %v565_v4 = vmin.f32 %v558_v1, %v564_v3  ;;  %v1193_v1 = vmov 0.0  }
 0x104   : > { %v569_v5 = vmin.f32 %v565_v4, %v567_v2 }
 0x106   : > { %v570_v11 = vmin.f32 %v568_v63, %v569_v5  ;;  %v1194_v5 = vmov 1.0|1.0  }
 0x108   : > { %v571_v12 = vrot.slane %v570_v11, 4 }
 0x10a   : > { %v572_v14 = vmin.f32 %v570_v11, %v571_v12 }
 0x10c   : > { %v573_v15 = vrot.slane %v572_v14, 2 }
 0x10e   : > { %v574_v20 = vmin.f32 %v572_v14, %v573_v15 }
 0x110   : > { %v575_v24 = vrot.slane %v574_v20, 1 }
 0x112   : > { %v576_v29 = vmin.f32 %v574_v20, %v575_v24 }
 0x114   : > { %vm579_vm3 = vcmp.eq.f32.partialorder %v532_v54, %v576_v29  ;;  %vm580_vm4 = vcmp.eq.f32.partialorder %v533_v49, %v576_v29  ;;  %vm583_vm5 = vcmp.eq.f32.partialorder %v536_v61, %v576_v29  ;;  %vm584_vm6 = vcmp.eq.f32.partialorder %v537_v60, %v576_v29 }
 0x115   : > { %v587_v34 = vsel %vm579_vm3, %v549_v25, 64.0  ;;  %v588_v36 = vsel %vm580_vm4, %v550_v26, 64.0  ;;  %v591_v37 = vsel %vm583_vm5, %v553_v27, 64.0  ;;  %v592_v39 = vsel %vm584_vm6, %v554_v28, 64.0 }
 0x116   : > { %v595_v40 = vsel %vm555_vm2, %v587_v34, inf  ;;  %v596_v41 = vsel %vm555_vm2, %v588_v36, inf  ;;  %v601_v42 = vsel %vm555_vm2, %v591_v37, inf  ;;  %v603_v43 = vsel %vm555_vm2, %v592_v39, inf }
 0x117   : > { %v602_v45 = vmin.f32 %v595_v40, %v601_v42  ;;  %v604_v47 = vmin.f32 %v596_v41, %v603_v43  ;;  %vm577_vm7 = vcmp.eq.f32.partialorder %v1331_v38, %v576_v29  ;;  %vm578_vm8 = vcmp.eq.f32.partialorder %v1329_v35, %v576_v29 }
 0x118   : > { %vm581_vm9 = vcmp.eq.f32.partialorder %v1337_v46, %v576_v29  ;;  %vm582_vm10 = vcmp.eq.f32.partialorder %v1333_v44, %v576_v29  ;;  %v585_v48 = vsel %vm577_vm7, %v547_v30, 64.0  ;;  %v586_v49 = vsel %vm578_vm8, %v548_v31, 64.0 }
 0x119   : > { %v606_v50 = vmin.f32 %v602_v45, %v604_v47  ;;  %v589_v51 = vsel %vm581_vm9, %v551_v32, 64.0  ;;  %v590_v52 = vsel %vm582_vm10, %v552_v33, 64.0  ;;  %v593_v53 = vsel %vm555_vm2, %v585_v48, inf }
 0x11a   : > { %v594_v54 = vsel %vm555_vm2, %v586_v49, inf  ;;  %v597_v55 = vsel %vm555_vm2, %v589_v51, inf  ;;  %v599_v56 = vsel %vm555_vm2, %v590_v52, inf  ;;  %v615_v61 = vand.u32 127, %v538_v9 }
 0x11b   : > { %v598_v38 = vmin.f32 %v593_v53, %v597_v55  ;;  %v600_v57 = vmin.f32 %v594_v54, %v599_v56 }
 0x11c   : > { %vm619_vm11 = vcmp.lt.s32.totalorder %v615_v61, 8 }
 0x11d   : > { %v605_v35 = vmin.f32 %v598_v38, %v600_v57 }
 0x11f   : > { %v607_v58 = vmin.f32 %v605_v35, %v606_v50 }
 0x121   : > { %v608_v46 = vrot.slane %v607_v58, 4 }
 0x123   : > { %v609_v59 = vmin.f32 %v607_v58, %v608_v46 }
 0x125   : > { %v610_v44 = vrot.slane %v609_v59, 2 }
 0x127   : > { %v611_v60 = vmin.f32 %v609_v59, %v610_v44 }
 0x129   : > { %v612_v62 = vrot.slane %v611_v60, 1 }
 0x12b   : > { %v613_v63 = vmin.f32 %v611_v60, %v612_v62 }
 0x12d   : > { %vm620_vm12 = vcmp.eq.f32.partialorder %v547_v30, %v613_v63  ;;  %vm621_vm13 = vcmp.eq.f32.partialorder %v548_v31, %v613_v63  ;;  %vm622_vm15 = vcmp.eq.f32.partialorder %v549_v25, %v613_v63  ;;  %vm623_vm3 = vcmp.eq.f32.partialorder %v550_v26, %v613_v63  ;;  %v341_v25 = vld [vmem:[%s1491_s2 + $0x8] sm:$0xff]  ;;  %v342_v26 = vld [vmem:[%s1491_s2 + $0x10] sm:$0xff] }
 0x12e   : > { %vm1381_vm14 = vmand %vm620_vm12, %vm619_vm11  ;;  %vm624_vm6 = vcmp.eq.f32.partialorder %v551_v32, %v613_v63  ;;  %vm625_vm8 = vcmp.eq.f32.partialorder %v552_v33, %v613_v63  ;;  %vm626_vm12 = vcmp.eq.f32.partialorder %v553_v27, %v613_v63 }
 0x12f   : > { %vm631_vm0 = vmand %vm621_vm13, %vm619_vm11  ;;  %v1023_v2 = vsel %vm1381_vm14, 1.0, %v1193_v1 }
 0x130   : > { %vm1123_vm4 = vmpackc.low %vm631_vm0, %vm1381_vm14  ;;  %v1024_v3 = vsel %vm631_vm0, 1.0, %v1193_v1  ;;  %v756_v4 = vsel %vm555_vm2, %v1023_v2, 0.0  ;;  %vm627_vm14 = vcmp.eq.f32.partialorder %v554_v28, %v613_v63  ;;  %v343_v28 = vld [vmem:[%s1491_s2 + $0x18] sm:$0xff] }
 0x131   : > { %1124 = vmatprep.subr.msk.bf16.mxu1 %vm1123_vm4, %v1194_v5  ;;  %v759_v9 = vsel %vm555_vm2, %v1024_v3, 0.0  ;;  %757 = vadd.xlane.f32.xlu0 %v756_v4  ;;  %vm1393_vm5 = vmand %vm622_vm15, %vm619_vm11 }
 0x132   : > { %760 = vadd.xlane.f32.xlu1 %v759_v9  ;;  %1126 = vmatpush3.bf16.msk.msra.mxu1 %vm1123_vm4, %v1194_v5  ;;  %vm633_vm7 = vmand %vm623_vm3, %vm619_vm11  ;;  %v1025_v12 = vsel %vm1393_vm5, 1.0, %v1193_v1 }
 0x133   : > { %vm1127_vm9 = vmpackc.low %vm633_vm7, %vm1393_vm5  ;;  %v762_v14 = vsel %vm555_vm2, %v1025_v12, 0.0  ;;  %v1026_v17 = vsel %vm633_vm7, 1.0, %v1193_v1 }
 0x134   : > { %1128 = vmatprep.subr.msk.bf16.mxu1 %vm1127_vm9, %v1194_v5  ;;  %vm1403_vm10 = vmand %vm624_vm6, %vm619_vm11  ;;  %v765_v21 = vsel %vm555_vm2, %v1026_v17, 0.0 }
 0x135   : > { %v1027_v15 = vsel %vm1403_vm10, 1.0, %v1193_v1  ;;  %763 = vadd.xlane.f32.xlu0 %v762_v14  ;;  %vm1413_vm13 = vmand %vm625_vm8, %vm619_vm11 }
 0x136   : > { %v768_v20 = vsel %vm555_vm2, %v1027_v15, 0.0  ;;  %1130 = vmatpush3.bf16.msk.msra.mxu1 %vm1127_vm9, %v1194_v5  ;;  %vm1131_vm15 = vmpackc.low %vm1413_vm13, %vm1403_vm10  ;;  %v1028_v19 = vsel %vm1413_vm13, 1.0, %v1193_v1 }
 0x137   : > { %769 = vadd.xlane.f32.xlu1 %v768_v20  ;;  %1132 = vmatprep.subr.msk.bf16.mxu1 %vm1131_vm15, %v1194_v5  ;;  %vm636_vm0 = vmand %vm626_vm12, %vm619_vm11  ;;  %v771_v23 = vsel %vm555_vm2, %v1028_v19, 0.0 }
 0x138   : > { %v1029_v18 = vsel %vm636_vm0, 1.0, %v1193_v1  ;;  %vm637_vm3 = vmand %vm627_vm14, %vm619_vm11  ;;  %vm780_vm11 = vcmask 7168  }
 0x139   : > { %766 = vadd.xlane.f32.xlu0 %v765_v21  ;;  %v774_v22 = vsel %vm555_vm2, %v1029_v18, 0.0  ;;  %vm1135_vm4 = vmpackc.low %vm637_vm3, %vm636_vm0  ;;  %v1030_v24 = vsel %vm637_vm3, 1.0, %v1193_v1 }
 0x13a   : > { %1134 = vmatpush3.bf16.msk.msra.mxu1 %vm1131_vm15, %v1194_v5  ;;  %v777_v27 = vsel %vm555_vm2, %v1030_v24, 0.0 }
 0x13b   : > { %775 = vadd.xlane.f32.xlu1 %v774_v22  ;;  %1136 = vmatprep.subr.msk.bf16.mxu1 %vm1135_vm4, %v1194_v5 }
 0x13d   : > { %772 = vadd.xlane.f32.xlu0 %v771_v23 }
 0x13e   : > { %1138 = vmatpush3.bf16.msk.msra.mxu1 %vm1135_vm4, %v1194_v5 }
 0x141   : > { %1110 = vmatmul.mubr.msk.f32.vlgmr.msra.gmra.mrb[0].mxu1 %vm654_vm1, %v341_v25  ;;  %778 = vadd.xlane.f32.xlu0 %v777_v27 }
 0x142   : > { %1112 = vmatprep.mubr.msk.f32.mxu1 %vm654_vm1, %v342_v26 }
 0x145   : > { %1113 = vmatmul.mubr.msk.f32.gmra.mrb[2].mxu1 %vm654_vm1, %v343_v28 }
 0x1be   : > { %v758_v29 = vpop.xlane.xlu0 %757 }
 0x1bf   : > { %v761_v30 = vpop.xlane.xlu1 %760  ;;  %781 = vst.msk [vmem:[%s318_s10] sm:$0xff] %vm780_vm11, %v758_v29 }
 0x1c0   : > { %782 = vst.msk [vmem:[%s318_s10 + $0x8] sm:$0xff] %vm780_vm11, %v761_v30 }
 0x1c2   : > { %v764_v31 = vpop.xlane.xlu0 %763 }
 0x1c3   : > { %783 = vst.msk [vmem:[%s318_s10 + $0x10] sm:$0xff] %vm780_vm11, %v764_v31 }
 0x1c4   : > { %v770_v32 = vpop.xlane.xlu1 %769 }
 0x1c5   : > { %785 = vst.msk [vmem:[%s318_s10 + $0x20] sm:$0xff] %vm780_vm11, %v770_v32 }
 0x1c6   : > { %v767_v33 = vpop.xlane.xlu0 %766 }
 0x1c7   : > { %784 = vst.msk [vmem:[%s318_s10 + $0x18] sm:$0xff] %vm780_vm11, %v767_v33 }
 0x1c8   : > { %v776_v34 = vpop.xlane.xlu1 %775 }
 0x1c9   : > { %787 = vst.msk [vmem:[%s318_s10 + $0x30] sm:$0xff] %vm780_vm11, %v776_v34 }
 0x1ca   : > { %v773_v36 = vpop.xlane.xlu0 %772 }
 0x1cb   : > { %786 = vst.msk [vmem:[%s318_s10 + $0x28] sm:$0xff] %vm780_vm11, %v773_v36 }
 0x1ce   : > { %v779_v37 = vpop.xlane.xlu0 %778 }
 0x1cf   : > { %788 = vst.msk [vmem:[%s318_s10 + $0x38] sm:$0xff] %vm780_vm11, %v779_v37 }
 0x214   : > { %v1111_v39 = vpop.f32.mrb[0].mxu1 }
 0x215   : > { %753 = vst.msk [vmem:[%s309_s12 + $0x8] sm:$0xff] %vm555_vm2, %v1111_v39  ;;  %v790_v40 = vsub.f32 %v1275_v7, %v1111_v39  ;;  %v733_v41 = vpop.f32.mrb[1].mxu1 }
 0x216   : > { %752 = vst.msk [vmem:[%s309_s12] sm:$0xff] %vm555_vm2, %v733_v41  ;;  %v789_v42 = vsub.f32 %v1273_v6, %v733_v41 }
 0x217   : > { %v794_v43 = vmul.f32 %v790_v40, %v790_v40 }
 0x218   : > { %v793_v45 = vmul.f32 %v789_v42, %v789_v42  ;;  %v1114_v47 = vpop.f32.mrb[2].mxu1 }
 0x219   : > { %755 = vst.msk [vmem:[%s309_s12 + $0x18] sm:$0xff] %vm555_vm2, %v1114_v47  ;;  %v792_v48 = vsub.f32 %v1281_v10, %v1114_v47  ;;  %v743_v49 = vpop.f32.mrb[3].mxu1  ;;  %v800_v50 = vsel %vm555_vm2, %v794_v43, 0.0 }
 0x21a   : > { %754 = vst.msk [vmem:[%s309_s12 + $0x10] sm:$0xff] %vm555_vm2, %v743_v49  ;;  %v791_v7 = vsub.f32 %v1277_v8, %v743_v49  ;;  %801 = vadd.xlane.f32.xlu0 %v800_v50  ;;  %v797_v51 = vsel %vm555_vm2, %v793_v45, 0.0 }
 0x21b   : > { %v796_v52 = vmul.f32 %v792_v48, %v792_v48  ;;  %798 = vadd.xlane.f32.xlu1 %v797_v51 }
 0x21c   : > { %v795_v6 = vmul.f32 %v791_v7, %v791_v7 }
 0x21d   : > { %v806_v53 = vsel %vm555_vm2, %v796_v52, 0.0 }
 0x21e   : > { %807 = vadd.xlane.f32.xlu0 %v806_v53  ;;  %v803_v54 = vsel %vm555_vm2, %v795_v6, 0.0 }
 0x21f   : > { %804 = vadd.xlane.f32.xlu1 %v803_v54 }
 0x2a7   : > { %v802_v10 = vpop.xlane.xlu0 %801 }
 0x2a8   : > { %810 = vst.msk [vmem:[%s327_s15 + $0x8] sm:$0xff] %vm780_vm11, %v802_v10  ;;  %v799_v8 = vpop.xlane.xlu1 %798 }
 0x2a9   : > { %809 = vst.msk [vmem:[%s327_s15] sm:$0xff] %vm780_vm11, %v799_v8 }
 0x2ab   : > { %v808_v55 = vpop.xlane.xlu0 %807 }
 0x2ac   : > { %812 = vst.msk [vmem:[%s327_s15 + $0x18] sm:$0xff] %vm780_vm11, %v808_v55  ;;  %v805_v56 = vpop.xlane.xlu1 %804 }
 0x2ad   : > { %811 = vst.msk [vmem:[%s327_s15 + $0x10] sm:$0xff] %vm780_vm11, %v805_v56 }
 0x2ae PF: > { %s17_s23 = sadd.s32 1, %s1190_s23   ;;  %s1504_s21 = smov %s1186_s22 }
 0x2af   : > { %p14_p5 = scmp.ge.s32.totalorder %s17_s23, 4   ;;  %s1505_s22 = smov %s1507_s24 }
 0x2b1   :  { %16 = sbr.rel (!%p14_p5) target bundleno = 2 (0x2), region = 90 }

</bundles_post_ra>
